<compile_context>
chip_gen: v7x
topology: tpu7x:2x2x1
jax: 0.10.0
libtpu: 0.0.40
codegen_flags: <defaults>
</compile_context>

<pallas_src>
import functools

import jax
import jax.numpy as jnp
from jax.experimental import pallas as pl
from jax.experimental.pallas import tpu as pltpu


def _mlp_proj_kernel(x_ref, w_ref, b_ref, o_ref):
    # x_ref: (C8, T) channel-major slab (native NCHW layout, lane-dense on T)
    # w_ref: (C8, E)   b_ref: (1, E)   o_ref: (T, E)
    xt = x_ref[...].T  # on-chip transpose: (C8, T) -> (T, C8), tile-aligned
    acc = jnp.dot(xt, w_ref[...], preferred_element_type=jnp.float32)
    o_ref[...] = (acc + b_ref[...].astype(jnp.float32)).astype(o_ref.dtype)


def _ceil_to(a, m):
    return (a + m - 1) // m * m


def _padded_block_bytes(rows, cols, itemsize):
    # VMEM tiles pad second-minor to 8 and minor to 128.
    return _ceil_to(max(rows, 1), 8) * _ceil_to(max(cols, 1), 128) * itemsize


def _pick_tile_hw(hw_pad, c8, e, itemsize, max_tile_hw):
    """Largest multiple-of-128 divisor of hw_pad under a conservative VMEM budget."""
    budget = 24 * 1024 * 1024  # conservative for v7x (64 MiB physical VMEM)
    cap = min(hw_pad, max_tile_hw)
    cap -= cap % 128
    t = max(cap, 128)
    while t > 128:
        fp = (2 * _padded_block_bytes(c8, t, itemsize)    # x slab, dbl-buffered
              + 2 * _padded_block_bytes(t, e, itemsize)   # out, dbl-buffered
              + _padded_block_bytes(t, e, 4)              # f32 accumulator
              + _padded_block_bytes(t, c8, 4))            # transposed lhs
        if hw_pad % t == 0 and fp <= budget:
            return t
        t -= 128
    return 128


@functools.partial(jax.jit, static_argnames=("max_tile_hw",))
def mlp_forward(x_nchw, weight, bias, max_tile_hw=2048):
    """Equivalent of ESFPNet MLP.forward.

    x_nchw: (B, C, H, W)
    weight: (C, E)  (transposed from PyTorch's (E, C))
    bias:   (E,)
    returns (B, H*W, E)
    """
    B, C, H, W = x_nchw.shape
    E = weight.shape[1]
    HW = H * W

    # Free (bitcast) reshape: keep the native channel-major layout; the
    # token-major transpose happens on-chip inside the kernel.
    x3d = x_nchw.reshape(B, C, HW)

    # Alignment (usually no-ops): channels -> multiple of 8 so the in-kernel
    # transpose is sublane-aligned; tokens -> multiple of 128 for lane-dense
    # blocks.  Real ESFPNet stages (C in {64,128,320,512}, HW = H*W of conv
    # maps) hit neither pad.
    C8 = _ceil_to(C, 8)
    HW_pad = _ceil_to(HW, 128)
    if C8 != C or HW_pad != HW:
        x3d = jnp.pad(x3d, ((0, 0), (0, C8 - C), (0, HW_pad - HW)))
    w2d = weight if C8 == C else jnp.pad(weight, ((0, C8 - C), (0, 0)))
    bias2d = bias.reshape(1, E)

    itemsize = x3d.dtype.itemsize
    tile_hw = _pick_tile_hw(HW_pad, C8, E, itemsize, max_tile_hw)
    grid = (B, HW_pad // tile_hw)

    vmem_need = (2 * _padded_block_bytes(C8, tile_hw, itemsize)
                 + 2 * _padded_block_bytes(tile_hw, E, itemsize)
                 + _padded_block_bytes(tile_hw, E, 4)
                 + _padded_block_bytes(tile_hw, C8, 4)
                 + 2 * _padded_block_bytes(C8, E, w2d.dtype.itemsize)
                 + 2 * _padded_block_bytes(1, E, bias.dtype.itemsize))
    vmem_limit = int(min(64 * 1024 * 1024,
                         max(16 * 1024 * 1024, 2 * vmem_need)))

    cost = pl.CostEstimate(
        flops=2 * B * HW * C * E,
        transcendentals=0,
        bytes_accessed=(x3d.size * itemsize
                        + w2d.size * w2d.dtype.itemsize
                        + B * HW_pad * E * itemsize),
    )

    out = pl.pallas_call(
        _mlp_proj_kernel,
        out_shape=jax.ShapeDtypeStruct((B, HW_pad, E), x3d.dtype),
        grid_spec=pltpu.PrefetchScalarGridSpec(
            num_scalar_prefetch=0,
            grid=grid,
            in_specs=[
                # Native NCHW slab: (C8, tile_hw), lane-dense along tokens.
                pl.BlockSpec((None, C8, tile_hw), lambda b, j: (b, 0, j)),
                pl.BlockSpec((C8, E), lambda b, j: (0, 0)),
                pl.BlockSpec((1, E), lambda b, j: (0, 0)),
            ],
            out_specs=pl.BlockSpec((None, tile_hw, E), lambda b, j: (b, j, 0)),
        ),
        compiler_params=pltpu.CompilerParams(
            dimension_semantics=("parallel", "parallel"),
            vmem_limit_bytes=vmem_limit,
        ),
        cost_estimate=cost,
    )(x3d, w2d, bias2d)

    if HW_pad != HW:
        out = out[:, :HW, :]
    return out


def mlp_reference(x_nchw, weight, bias):
    B, C, H, W = x_nchw.shape
    x_tokens = jnp.transpose(x_nchw.reshape(B, C, H * W), (0, 2, 1))
    return x_tokens @ weight + bias


if __name__ == "__main__":
    # Small shapes consistent with the module: input_dim=C=4, embed_dim=32.
    B, C, H, W = 2, 4, 16, 16
    E = 32

    key = jax.random.PRNGKey(0)
    kx, kw, kb = jax.random.split(key, 3)

    x = jax.random.normal(kx, (B, C, H, W), dtype=jnp.float32)
    # nn.Linear(input_dim=C, embed_dim=E): weight (E, C), bias (E,).
    bound = 1.0 / (C ** 0.5)
    w_torch_layout = jax.random.uniform(kw, (E, C), minval=-bound, maxval=bound,
                                        dtype=jnp.float32)
    b = jax.random.uniform(kb, (E,), minval=-bound, maxval=bound,
                           dtype=jnp.float32)
    w = w_torch_layout.T  # (C, E) for x @ W

    out = mlp_forward(x, w, b)
    jax.block_until_ready(out)

    ref = mlp_reference(x, w, b)
    assert out.shape == (B, H * W, E), out.shape
    assert jnp.allclose(out, ref, atol=1e-5, rtol=1e-5), (
        float(jnp.max(jnp.abs(out - ref)))
    )
    print("KERNEL_OK")
</pallas_src>

<mosaic_0001>
module attributes {stable_mosaic.version = 11 : i64} {
  func.func @_mlp_proj_kernel(%arg0: i32, %arg1: i32, %arg2: memref<1x8x256xf32, #tpu.memory_space<vmem>>, %arg3: memref<8x32xf32, #tpu.memory_space<vmem>>, %arg4: memref<1x32xf32, #tpu.memory_space<vmem>>, %arg5: memref<1x256x32xf32, #tpu.memory_space<vmem>>) attributes {dimension_semantics = [#tpu.dimension_semantics<parallel>, #tpu.dimension_semantics<parallel>], iteration_bounds = array<i64: 2, 1>, scalar_prefetch = 0 : i64, scratch_operands = 0 : i64, tpu.core_type = #tpu.core_type<tc>, window_params = [{transform_indices = @transform_0, window_bounds = array<i64: 1, 8, 256>}, {pipeline_mode = #tpu.pipeline_mode<synchronous>, transform_indices = @transform_1, window_bounds = array<i64: 8, 32>}, {pipeline_mode = #tpu.pipeline_mode<synchronous>, transform_indices = @transform_2, window_bounds = array<i64: 1, 32>}, {transform_indices = @transform_3, window_bounds = array<i64: 1, 256, 32>}]} {
    %c0 = arith.constant 0 : index
    %c0_0 = arith.constant 0 : index
    %c0_1 = arith.constant 0 : index
    %0 = vector.load %arg2[%c0, %c0_0, %c0_1] : memref<1x8x256xf32, #tpu.memory_space<vmem>>, vector<1x8x256xf32>
    %1 = vector.shape_cast %0 : vector<1x8x256xf32> to vector<8x256xf32>
    %2 = tpu.transpose %1, [1, 0] : vector<8x256xf32> -> vector<256x8xf32>
    %c0_2 = arith.constant 0 : index
    %c0_3 = arith.constant 0 : index
    %3 = vector.load %arg3[%c0_2, %c0_3] : memref<8x32xf32, #tpu.memory_space<vmem>>, vector<8x32xf32>
    %cst = arith.constant dense<0.000000e+00> : vector<256x32xf32>
    %4 = tpu.matmul %2, %3, %cst {dimension_numbers = #tpu.dot_dimension_numbers<[1], [0], [0], [1], [0, 0, 1, 1], [], []>} : vector<256x8xf32>, vector<8x32xf32>, vector<256x32xf32> -> vector<256x32xf32>
    %c0_4 = arith.constant 0 : index
    %c0_5 = arith.constant 0 : index
    %5 = vector.load %arg4[%c0_4, %c0_5] : memref<1x32xf32, #tpu.memory_space<vmem>>, vector<1x32xf32>
    %6 = vector.broadcast %5 : vector<1x32xf32> to vector<256x32xf32>
    %7 = arith.addf %4, %6 : vector<256x32xf32>
    %c0_6 = arith.constant 0 : index
    %c0_7 = arith.constant 0 : index
    %c0_8 = arith.constant 0 : index
    %8 = vector.load %arg5[%c0_6, %c0_7, %c0_8] : memref<1x256x32xf32, #tpu.memory_space<vmem>>, vector<1x256x32xf32>
    %9 = vector.shape_cast %8 : vector<1x256x32xf32> to vector<256x32xf32>
    %10 = vector.shape_cast %7 : vector<256x32xf32> to vector<1x256x32xf32>
    tpu.vector_store %arg5[%c0_6, %c0_7, %c0_8], %10 {strides = array<i32>} : memref<1x256x32xf32, #tpu.memory_space<vmem>>, vector<1x256x32xf32>,
    return
  }
  func.func @transform_0(%arg0: i32, %arg1: i32) -> (i32, i32, i32) {
    %c0_i32 = arith.constant 0 : i32
    %c0_i32_0 = arith.constant 0 : i32
    return %arg0, %c0_i32, %arg1 : i32, i32, i32
  }
  func.func @transform_1(%arg0: i32, %arg1: i32) -> (i32, i32) {
    %c0_i32 = arith.constant 0 : i32
    %c0_i32_0 = arith.constant 0 : i32
    %c0_i32_1 = arith.constant 0 : i32
    return %c0_i32, %c0_i32_0 : i32, i32
  }
  func.func @transform_2(%arg0: i32, %arg1: i32) -> (i32, i32) {
    %c0_i32 = arith.constant 0 : i32
    %c0_i32_0 = arith.constant 0 : i32
    %c0_i32_1 = arith.constant 0 : i32
    return %c0_i32, %c0_i32_0 : i32, i32
  }
  func.func @transform_3(%arg0: i32, %arg1: i32) -> (i32, i32, i32) {
    %c0_i32 = arith.constant 0 : i32
    %c0_i32_0 = arith.constant 0 : i32
    return %arg0, %arg1, %c0_i32 : i32, i32, i32
  }
}

</mosaic_0001>

<bundles_post_ra>
// kernel: mlp_forward.1
= control target key start
LH: loop header
LB: loop body
LE: loop exit
PB: predicated region body
PF: predicated region fallthrough
CT: control target
= control target key end

     0   :  { %s926_s12 = smov 0   ;;  %s928_s13 = smov 0   ;;  %s1101_s0 = inlined_call_operand.vmem [shape: f32[2,8,256], index: 0, kind: input, shape index: {}]   ;;  %s1102_s1 = inlined_call_operand.vmem [shape: f32[8,32], index: 1, kind: input, shape index: {}]   ;;  %s1103_s2 = inlined_call_operand.vmem [shape: f32[1,32], index: 2, kind: input, shape index: {}]   ;;  %s1104_s3 = inlined_call_operand.vmem [shape: f32[2,256,32], index: 3, kind: output, shape index: {}]  }
   0x1   :  { %s930_s14 = smov 0  }
   0x2 LB: > { %s25_s15 = sadd.s32 1, %s900_s13  ;;  %p730_p0 = scmp.ge.s32.totalorder %s904_s14, 1  ;;  %s904_s14 = sphi %s930_s14, %s13_s14   ;;  %s900_s13 = sphi %s928_s13, %s1106_s13   ;;  %s896_s12 = sphi %s926_s12, %s1105_s12  }
   0x3   : > { %p27_p1 = scmp.ge.s32.totalorder %s25_s15, 2  ;;  %p158_p2 = scmp.lt.s32.totalorder %s904_s14, 3 }
   0x5   : > { %s1108_s15 = smov (%p27_p1, %s25_s15), 0  ;;  %p159_p3 = pnand %p730_p0, %p158_p2 }
   0x6   : > { %p191_p4 = scmp.lt.s32.totalorder (!%p159_p3), %s896_s12, 1  ;;  %v276_v1 = vld [vmem:[%s1102_s1] sm:$0xff] (!%p159_p3)  ;;  %vm284_vm0 = vcmask (!%p159_p3), 64512   ;;  %vm606_vm1 = vcmask (!%p159_p3), 261120  }
   0x7   : > { %162 = sbr.rel (%p159_p3) target bundleno = 487 (0x1e7), region = 32  ;;  %805 = vmatprep.subr.mxu0 (!%p159_p3), %v276_v1  ;;  %855 = vmatprep.subr.mxu1 (!%p159_p3), %v276_v1  ;;  %v989_v35 = vld [vmem:[%s1103_s2] ss:$0 sm:$0xff] (!%p159_p3) }
   0x8   : > { %806 = vmatpush3.msra.mxu0 (!%p159_p3), %v276_v1  ;;  %856 = vmatpush3.msra.mxu1 (!%p159_p3), %v276_v1 }
   0xe   : > { %s1110_s12 = smov (!%p191_p4, %s896_s12), 1 }
   0xf   : > { %s770_s16 = sshll.u32 %s1110_s12, 4  ;;  %s771_s22 = sshll.u32 %s1110_s12, 8 }
  0x10   : > { %s198_s19 = scalar_lea.vmem %s1101_s0, %s770_s16  ;;  %s994_s27 = scalar_lea.vmem %s1104_s3, %s771_s22 }
  0x11   : > { %v210_v0 = vld [vmem:[%s198_s19] sm:$0xff]  ;;  %v211_v2 = vld [vmem:[%s198_s19 + $0x8] sm:$0xff] }
  0x12   : > { %212 = vxpose.xlu0.b32.start.end [1/1] (short) %v210_v0, 128 }
  0x4f   : > { %244 = vxpose.xlu0.b32.start.end [1/1] (short) %v211_v2, 128 }
  0x92   : > { %v228_v3 = vpop.trf.xlu0 }
  0x93   : > { %807 = vmatprep.mubr.msk.f32.mxu0 %vm284_vm0, %v228_v3 }
  0x96   : > { %v229_v4 = vpop.trf.xlu0 }
  0x97   : > { %808 = vmatmul.mubr.msk.f32.vlgmr.msra.gmra.mrb[0].mxu0 %vm284_vm0, %v229_v4 }
  0x9a   : > { %v230_v5 = vpop.trf.xlu0 }
  0x9b   : > { %810 = vmatprep.mubr.msk.f32.mxu0 %vm284_vm0, %v230_v5 }
  0x9e   : > { %v231_v6 = vpop.trf.xlu0 }
  0x9f   : > { %811 = vmatmul.mubr.msk.f32.gmra.mrb[2].mxu0 %vm284_vm0, %v231_v6 }
  0xa2   : > { %v232_v7 = vpop.trf.xlu0 }
  0xa3   : > { %813 = vmatprep.mubr.msk.f32.mxu0 %vm284_vm0, %v232_v7 }
  0xa6   : > { %v233_v8 = vpop.trf.xlu0 }
  0xa7   : > { %814 = vmatmul.mubr.msk.f32.gmra.mrb[4].mxu0 %vm284_vm0, %v233_v8 }
  0xaa   : > { %v234_v9 = vpop.trf.xlu0 }
  0xab   : > { %816 = vmatprep.mubr.msk.f32.mxu0 %vm284_vm0, %v234_v9 }
  0xae   : > { %v235_v10 = vpop.trf.xlu0 }
  0xaf   : > { %817 = vmatmul.mubr.msk.f32.gmra.mrb[6].mxu0 %vm284_vm0, %v235_v10 }
  0xb2   : > { %v236_v11 = vpop.trf.xlu0 }
  0xb3   : > { %819 = vmatprep.mubr.msk.f32.mxu0 %vm284_vm0, %v236_v11 }
  0xb6   : > { %v237_v12 = vpop.trf.xlu0 }
  0xb7   : > { %820 = vmatmul.mubr.msk.f32.gmra.mrb[8].mxu0 %vm284_vm0, %v237_v12 }
  0xba   : > { %v238_v13 = vpop.trf.xlu0 }
  0xbb   : > { %822 = vmatprep.mubr.msk.f32.mxu0 %vm284_vm0, %v238_v13 }
  0xbe   : > { %v239_v14 = vpop.trf.xlu0 }
  0xbf   : > { %823 = vmatmul.mubr.msk.f32.gmra.mrb[10].mxu0 %vm284_vm0, %v239_v14 }
  0xc2   : > { %v240_v15 = vpop.trf.xlu0 }
  0xc3   : > { %825 = vmatprep.mubr.msk.f32.mxu0 %vm284_vm0, %v240_v15 }
  0xc6   : > { %v241_v16 = vpop.trf.xlu0 }
  0xc7   : > { %826 = vmatmul.mubr.msk.f32.gmra.mrb[12].mxu0 %vm284_vm0, %v241_v16 }
  0xca   : > { %v242_v17 = vpop.trf.xlu0 }
  0xcb   : > { %828 = vmatprep.mubr.msk.f32.mxu0 %vm284_vm0, %v242_v17 }
  0xce   : > { %v243_v18 = vpop.trf.xlu0 }
  0xcf   : > { %829 = vmatmul.mubr.msk.f32.gmra.mrb[14].mxu0 %vm284_vm0, %v243_v18 }
  0xd2   : > { %v260_v19 = vpop.trf.xlu0 }
  0xd3   : > { %831 = vmatprep.mubr.msk.f32.mxu1 %vm284_vm0, %v260_v19 }
  0xd6   : > { %v261_v20 = vpop.trf.xlu0 }
  0xd7   : > { %832 = vmatmul.mubr.msk.f32.vlgmr.msra.gmra.mrb[0].mxu1 %vm284_vm0, %v261_v20 }
  0xda   : > { %v262_v21 = vpop.trf.xlu0 }
  0xdb   : > { %834 = vmatprep.mubr.msk.f32.mxu1 %vm284_vm0, %v262_v21 }
  0xde   : > { %v263_v22 = vpop.trf.xlu0 }
  0xdf   : > { %835 = vmatmul.mubr.msk.f32.gmra.mrb[2].mxu1 %vm284_vm0, %v263_v22 }
  0xe2   : > { %v264_v23 = vpop.trf.xlu0 }
  0xe3   : > { %837 = vmatprep.mubr.msk.f32.mxu1 %vm284_vm0, %v264_v23 }
  0xe6   : > { %v265_v24 = vpop.trf.xlu0 }
  0xe7   : > { %838 = vmatmul.mubr.msk.f32.gmra.mrb[4].mxu1 %vm284_vm0, %v265_v24 }
  0xea   : > { %v266_v25 = vpop.trf.xlu0 }
  0xeb   : > { %840 = vmatprep.mubr.msk.f32.mxu1 %vm284_vm0, %v266_v25 }
  0xee   : > { %v267_v26 = vpop.trf.xlu0 }
  0xef   : > { %841 = vmatmul.mubr.msk.f32.gmra.mrb[6].mxu1 %vm284_vm0, %v267_v26 }
  0xf2   : > { %v268_v27 = vpop.trf.xlu0 }
  0xf3   : > { %843 = vmatprep.mubr.msk.f32.mxu1 %vm284_vm0, %v268_v27 }
  0xf6   : > { %v269_v28 = vpop.trf.xlu0 }
  0xf7   : > { %844 = vmatmul.mubr.msk.f32.gmra.mrb[8].mxu1 %vm284_vm0, %v269_v28 }
  0xfa   : > { %v270_v29 = vpop.trf.xlu0 }
  0xfb   : > { %846 = vmatprep.mubr.msk.f32.mxu1 %vm284_vm0, %v270_v29 }
  0xfe   : > { %v271_v30 = vpop.trf.xlu0 }
  0xff   : > { %847 = vmatmul.mubr.msk.f32.gmra.mrb[10].mxu1 %vm284_vm0, %v271_v30 }
 0x102   : > { %v272_v31 = vpop.trf.xlu0 }
 0x103   : > { %849 = vmatprep.mubr.msk.f32.mxu1 %vm284_vm0, %v272_v31 }
 0x106   : > { %v273_v32 = vpop.trf.xlu0 }
 0x107   : > { %850 = vmatmul.mubr.msk.f32.gmra.mrb[12].mxu1 %vm284_vm0, %v273_v32 }
 0x10a   : > { %v274_v33 = vpop.trf.xlu0 }
 0x10b   : > { %852 = vmatprep.mubr.msk.f32.mxu1 %vm284_vm0, %v274_v33 }
 0x10e   : > { %v275_v34 = vpop.trf.xlu0 }
 0x10f   : > { %853 = vmatmul.mubr.msk.f32.gmra.mrb[14].mxu1 %vm284_vm0, %v275_v34 }
 0x16a   : > { %v809_v36 = vpop.f32.mrb[0].mxu0 }
 0x16b   : > { %v453_v37 = vadd.f32 %v809_v36, %v989_v35  ;;  %v447_v38 = vpop.f32.mrb[1].mxu0 }
 0x16c   : > { %v448_v39 = vadd.f32 %v989_v35, %v447_v38 }
 0x16d   : > { %608 = vst.msk [vmem:[%s994_s27 + $0x8] sm:$0xff] %vm606_vm1, %v453_v37 }
 0x16e   : > { %607 = vst.msk [vmem:[%s994_s27] sm:$0xff] %vm606_vm1, %v448_v39 }
 0x172   : > { %v812_v40 = vpop.f32.mrb[2].mxu0 }
 0x173   : > { %v463_v41 = vadd.f32 %v812_v40, %v989_v35  ;;  %v457_v42 = vpop.f32.mrb[3].mxu0 }
 0x174   : > { %v458_v43 = vadd.f32 %v989_v35, %v457_v42 }
 0x175   : > { %610 = vst.msk [vmem:[%s994_s27 + $0x18] sm:$0xff] %vm606_vm1, %v463_v41 }
 0x176   : > { %609 = vst.msk [vmem:[%s994_s27 + $0x10] sm:$0xff] %vm606_vm1, %v458_v43 }
 0x17a   : > { %v815_v44 = vpop.f32.mrb[4].mxu0 }
 0x17b   : > { %v473_v45 = vadd.f32 %v815_v44, %v989_v35  ;;  %v467_v46 = vpop.f32.mrb[5].mxu0 }
 0x17c   : > { %v468_v47 = vadd.f32 %v989_v35, %v467_v46 }
 0x17d   : > { %612 = vst.msk [vmem:[%s994_s27 + $0x28] sm:$0xff] %vm606_vm1, %v473_v45 }
 0x17e   : > { %611 = vst.msk [vmem:[%s994_s27 + $0x20] sm:$0xff] %vm606_vm1, %v468_v47 }
 0x182   : > { %v818_v48 = vpop.f32.mrb[6].mxu0 }
 0x183   : > { %v483_v49 = vadd.f32 %v818_v48, %v989_v35  ;;  %v477_v50 = vpop.f32.mrb[7].mxu0 }
 0x184   : > { %v478_v51 = vadd.f32 %v989_v35, %v477_v50 }
 0x185   : > { %614 = vst.msk [vmem:[%s994_s27 + $0x38] sm:$0xff] %vm606_vm1, %v483_v49 }
 0x186   : > { %613 = vst.msk [vmem:[%s994_s27 + $0x30] sm:$0xff] %vm606_vm1, %v478_v51 }
 0x18a   : > { %v821_v52 = vpop.f32.mrb[8].mxu0 }
 0x18b   : > { %v493_v53 = vadd.f32 %v821_v52, %v989_v35  ;;  %v487_v54 = vpop.f32.mrb[9].mxu0 }
 0x18c   : > { %v488_v55 = vadd.f32 %v989_v35, %v487_v54 }
 0x18d   : > { %616 = vst.msk [vmem:[%s994_s27 + $0x48] sm:$0xff] %vm606_vm1, %v493_v53 }
 0x18e   : > { %615 = vst.msk [vmem:[%s994_s27 + $0x40] sm:$0xff] %vm606_vm1, %v488_v55 }
 0x192   : > { %v824_v56 = vpop.f32.mrb[10].mxu0 }
 0x193   : > { %v503_v57 = vadd.f32 %v824_v56, %v989_v35  ;;  %v497_v58 = vpop.f32.mrb[11].mxu0 }
 0x194   : > { %v498_v59 = vadd.f32 %v989_v35, %v497_v58 }
 0x195   : > { %618 = vst.msk [vmem:[%s994_s27 + $0x58] sm:$0xff] %vm606_vm1, %v503_v57 }
 0x196   : > { %617 = vst.msk [vmem:[%s994_s27 + $0x50] sm:$0xff] %vm606_vm1, %v498_v59 }
 0x19a   : > { %v827_v60 = vpop.f32.mrb[12].mxu0 }
 0x19b   : > { %v513_v61 = vadd.f32 %v827_v60, %v989_v35  ;;  %v507_v62 = vpop.f32.mrb[13].mxu0 }
 0x19c   : > { %v508_v63 = vadd.f32 %v989_v35, %v507_v62 }
 0x19d   : > { %620 = vst.msk [vmem:[%s994_s27 + $0x68] sm:$0xff] %vm606_vm1, %v513_v61 }
 0x19e   : > { %619 = vst.msk [vmem:[%s994_s27 + $0x60] sm:$0xff] %vm606_vm1, %v508_v63 }
 0x1a2   : > { %v830_v0 = vpop.f32.mrb[14].mxu0 }
 0x1a3   : > { %v523_v1 = vadd.f32 %v830_v0, %v989_v35  ;;  %v517_v2 = vpop.f32.mrb[15].mxu0 }
 0x1a4   : > { %v518_v3 = vadd.f32 %v989_v35, %v517_v2 }
 0x1a5   : > { %622 = vst.msk [vmem:[%s994_s27 + $0x78] sm:$0xff] %vm606_vm1, %v523_v1 }
 0x1a6   : > { %621 = vst.msk [vmem:[%s994_s27 + $0x70] sm:$0xff] %vm606_vm1, %v518_v3 }
 0x1aa   : > { %v833_v4 = vpop.f32.mrb[0].mxu1 }
 0x1ab   : > { %v533_v5 = vadd.f32 %v833_v4, %v989_v35  ;;  %v527_v6 = vpop.f32.mrb[1].mxu1 }
 0x1ac   : > { %v528_v7 = vadd.f32 %v989_v35, %v527_v6 }
 0x1ad   : > { %624 = vst.msk [vmem:[%s994_s27 + $0x88] sm:$0xff] %vm606_vm1, %v533_v5 }
 0x1ae   : > { %623 = vst.msk [vmem:[%s994_s27 + $0x80] sm:$0xff] %vm606_vm1, %v528_v7 }
 0x1b2   : > { %v836_v8 = vpop.f32.mrb[2].mxu1 }
 0x1b3   : > { %v543_v9 = vadd.f32 %v836_v8, %v989_v35  ;;  %v537_v10 = vpop.f32.mrb[3].mxu1 }
 0x1b4   : > { %v538_v11 = vadd.f32 %v989_v35, %v537_v10 }
 0x1b5   : > { %626 = vst.msk [vmem:[%s994_s27 + $0x98] sm:$0xff] %vm606_vm1, %v543_v9 }
 0x1b6   : > { %625 = vst.msk [vmem:[%s994_s27 + $0x90] sm:$0xff] %vm606_vm1, %v538_v11 }
 0x1ba   : > { %v839_v12 = vpop.f32.mrb[4].mxu1 }
 0x1bb   : > { %v553_v13 = vadd.f32 %v839_v12, %v989_v35  ;;  %v547_v14 = vpop.f32.mrb[5].mxu1 }
 0x1bc   : > { %v548_v15 = vadd.f32 %v989_v35, %v547_v14 }
 0x1bd   : > { %628 = vst.msk [vmem:[%s994_s27 + $0xa8] sm:$0xff] %vm606_vm1, %v553_v13 }
 0x1be   : > { %627 = vst.msk [vmem:[%s994_s27 + $0xa0] sm:$0xff] %vm606_vm1, %v548_v15 }
 0x1c2   : > { %v842_v16 = vpop.f32.mrb[6].mxu1 }
 0x1c3   : > { %v563_v17 = vadd.f32 %v842_v16, %v989_v35  ;;  %v557_v18 = vpop.f32.mrb[7].mxu1 }
 0x1c4   : > { %v558_v19 = vadd.f32 %v989_v35, %v557_v18 }
 0x1c5   : > { %630 = vst.msk [vmem:[%s994_s27 + $0xb8] sm:$0xff] %vm606_vm1, %v563_v17 }
 0x1c6   : > { %629 = vst.msk [vmem:[%s994_s27 + $0xb0] sm:$0xff] %vm606_vm1, %v558_v19 }
 0x1ca   : > { %v845_v20 = vpop.f32.mrb[8].mxu1 }
 0x1cb   : > { %v573_v21 = vadd.f32 %v845_v20, %v989_v35  ;;  %v567_v22 = vpop.f32.mrb[9].mxu1 }
 0x1cc   : > { %v568_v23 = vadd.f32 %v989_v35, %v567_v22 }
 0x1cd   : > { %632 = vst.msk [vmem:[%s994_s27 + $0xc8] sm:$0xff] %vm606_vm1, %v573_v21 }
 0x1ce   : > { %631 = vst.msk [vmem:[%s994_s27 + $0xc0] sm:$0xff] %vm606_vm1, %v568_v23 }
 0x1d2   : > { %v848_v24 = vpop.f32.mrb[10].mxu1 }
 0x1d3   : > { %v583_v25 = vadd.f32 %v848_v24, %v989_v35  ;;  %v577_v26 = vpop.f32.mrb[11].mxu1 }
 0x1d4   : > { %v578_v27 = vadd.f32 %v989_v35, %v577_v26 }
 0x1d5   : > { %634 = vst.msk [vmem:[%s994_s27 + $0xd8] sm:$0xff] %vm606_vm1, %v583_v25 }
 0x1d6   : > { %633 = vst.msk [vmem:[%s994_s27 + $0xd0] sm:$0xff] %vm606_vm1, %v578_v27 }
 0x1da   : > { %v851_v28 = vpop.f32.mrb[12].mxu1 }
 0x1db   : > { %v593_v29 = vadd.f32 %v851_v28, %v989_v35  ;;  %v587_v30 = vpop.f32.mrb[13].mxu1 }
 0x1dc   : > { %v588_v31 = vadd.f32 %v989_v35, %v587_v30 }
 0x1dd   : > { %636 = vst.msk [vmem:[%s994_s27 + $0xe8] sm:$0xff] %vm606_vm1, %v593_v29 }
 0x1de   : > { %635 = vst.msk [vmem:[%s994_s27 + $0xe0] sm:$0xff] %vm606_vm1, %v588_v31 }
 0x1e2   : > { %v854_v32 = vpop.f32.mrb[14].mxu1 }
 0x1e3   : > { %v603_v33 = vadd.f32 %v854_v32, %v989_v35  ;;  %v597_v34 = vpop.f32.mrb[15].mxu1 }
 0x1e4   : > { %v598_v36 = vadd.f32 %v989_v35, %v597_v34 }
 0x1e5   : > { %638 = vst.msk [vmem:[%s994_s27 + $0xf8] sm:$0xff] %vm606_vm1, %v603_v33 }
 0x1e6   : > { %637 = vst.msk [vmem:[%s994_s27 + $0xf0] sm:$0xff] %vm606_vm1, %v598_v36 }
 0x1e7 PF: > { %s13_s14 = sadd.s32 1, %s904_s14   ;;  %s1105_s12 = smov %s900_s13 }
 0x1e8   : > { %p10_p5 = scmp.ge.s32.totalorder %s13_s14, 4   ;;  %s1106_s13 = smov %s1108_s15 }
 0x1ea   :  { %12 = sbr.rel (!%p10_p5) target bundleno = 2 (0x2), region = 62 }

</bundles_post_ra>
